<compile_context>
chip_gen: v7x
topology: tpu7x:2x2x1
jax: 0.10.0
libtpu: 0.0.40
codegen_flags: <defaults>
</compile_context>

<pallas_src>
import jax
import jax.numpy as jnp
import numpy as np
from jax.experimental import pallas as pl
from jax.experimental.pallas import tpu as pltpu

D = 6      # phase-space dimension: (x, px, y, py, tau, delta)
LANE = 128


def _round_up(x, m):
    return (x + m - 1) // m * m


def element_kernel(r_ref, x_ref, o_ref):
    """Apply the composed 6x6 transfer matrix to one particle tile.

    r_ref: (6, 6)   composed transfer matrix (VMEM, resident across tiles)
    x_ref: (6, TN)  coordinate tile (coords on sublanes, particles on lanes)
    o_ref: (6, TN)

    VPU formulation: out[i, n] = sum_j R[i, j] * x[j, n] as broadcast
    multiply-adds; keeps the MXU completely free (it would be <1% utilized).
    """
    x = x_ref[...]
    r = r_ref[...]
    acc = r[:, 0:1] * x[0:1, :]
    for j in range(1, D):
        acc = acc + r[:, j:j + 1] * x[j:j + 1, :]
    o_ref[...] = acc.astype(o_ref.dtype)


def element_forward_coords(bunch_dn, r_total, *, tn_max=8192):
    """Optimized path: bunch in coordinate-major (6, N) float32 layout.

    bunch_dn: (6, N) float32
    r_total:  (6, 6) float32 composed element transfer matrix
    returns:  (6, N) float32
    """
    d, n = bunch_dn.shape
    assert d == D

    # Tile choice: lane-aligned (multiple of 128), as large as useful (up to
    # tn_max) but capped so the grid keeps >= 2 steps for v7x's 2 TensorCores.
    tn = max(LANE, min(tn_max, _round_up(max(1, -(-n // 2)), LANE)))
    n_padded = _round_up(n, tn)
    if n_padded != n:
        bunch_dn = jnp.pad(bunch_dn, ((0, 0), (0, n_padded - n)))
    grid = (n_padded // tn,)

    cost = pl.CostEstimate(
        flops=2 * D * D * n_padded,
        transcendentals=0,
        bytes_accessed=(2 * D * n_padded + D * D) * 4,
    )

    out = pl.pallas_call(
        element_kernel,
        out_shape=jax.ShapeDtypeStruct((D, n_padded), bunch_dn.dtype),
        grid_spec=pltpu.PrefetchScalarGridSpec(
            num_scalar_prefetch=0,
            grid=grid,
            in_specs=[
                # composed matrix: same block every step -> stays resident
                pl.BlockSpec((D, D), lambda i: (0, 0)),
                # one lane-dense tile of particles
                pl.BlockSpec((D, tn), lambda i: (0, i)),
            ],
            out_specs=pl.BlockSpec((D, tn), lambda i: (0, i)),
        ),
        compiler_params=pltpu.CompilerParams(
            dimension_semantics=("parallel",),
        ),
        cost_estimate=cost,
    )(r_total, bunch_dn)

    if n_padded != n:
        out = out[:, :n]
    return out


def element_forward(bunch_nd, r_total, *, tn_max=8192):
    """PyTorch-style (N, 6) convenience wrapper.

    Prefer element_forward_coords and keep the bunch in (6, N) layout across
    the surrounding pipeline: the two transposes here each cost a full extra
    HBM pass for what is a purely memory-bound kernel.
    """
    return element_forward_coords(bunch_nd.T, r_total, tn_max=tn_max).T


def drift_rmatrix_np(length):
    """6x6 linear transfer matrix of a drift of given length (float64)."""
    r = np.eye(D, dtype=np.float64)
    r[0, 1] = length
    r[2, 3] = length
    return r


def make_element_maps(slices: int, total_length: float):
    """Per-slice weights (drift lengths), per-slice rMatrices, and the
    composed element rMatrix R_total = R_{S-1} @ ... @ R_0.

    Composition is done in float64 on the host (mirrors Element.rMatrix()),
    then cast to float32 for the kernel: for linear maps applying R_total once
    is mathematically identical to the per-slice loop and numerically better
    than S sequential float32 matmuls.
    """
    weights = np.full((slices,), total_length / slices, dtype=np.float64)
    r_stack = np.stack([drift_rmatrix_np(w) for w in weights], axis=0)
    r_total = np.eye(D, dtype=np.float64)
    for s in range(slices):
        r_total = r_stack[s] @ r_total
    return (
        jnp.asarray(weights, dtype=jnp.float32),
        jnp.asarray(r_stack, dtype=jnp.float32),
        jnp.asarray(r_total, dtype=jnp.float32),
    )


if __name__ == "__main__":
    slices = 4          # Element(slices=4, order=2)
    order = 2           # unused for linear maps (see TODO above)
    total_length = 1.5  # deterministic parameter init

    weights, r_stack, r_total = make_element_maps(slices, total_length)

    # small deterministic bunch: 1000 particles x 6 coords
    # (deliberately NOT a multiple of the tile -> exercises the padding path)
    n = 1000
    key = jax.random.PRNGKey(0)
    bunch_nd = jax.random.normal(key, (n, D), dtype=jnp.float32) * 1e-3

    # Keep the bunch coordinate-major (6, N) across the "pipeline"; the single
    # transpose here stands in for producing it in that layout upstream.
    bunch_dn = bunch_nd.T

    out_dn = element_forward_coords(bunch_dn, r_total)
    out_dn = jax.block_until_ready(out_dn)
    out_nd = out_dn.T

    # pure-JAX reference: sequential application of the per-slice maps,
    # exactly as Element.forward does (bunch = m(bunch) for each map).
    ref = bunch_nd
    for s in range(slices):
        ref = ref @ r_stack[s].T

    assert out_nd.shape == bunch_nd.shape
    assert jnp.allclose(out_nd, ref, rtol=1e-5, atol=1e-6)

    print("KERNEL_OK")
</pallas_src>

<mosaic_0001>
module attributes {stable_mosaic.version = 11 : i64} {
  func.func @element_kernel(%arg0: i32, %arg1: memref<6x6xf32, #tpu.memory_space<vmem>>, %arg2: memref<6x512xf32, #tpu.memory_space<vmem>>, %arg3: memref<6x512xf32, #tpu.memory_space<vmem>>) attributes {dimension_semantics = [#tpu.dimension_semantics<parallel>], iteration_bounds = array<i64: 2>, scalar_prefetch = 0 : i64, scratch_operands = 0 : i64, tpu.core_type = #tpu.core_type<tc>, window_params = [{pipeline_mode = #tpu.pipeline_mode<synchronous>, transform_indices = @transform_0, window_bounds = array<i64: 6, 6>}, {transform_indices = @transform_1, window_bounds = array<i64: 6, 512>}, {transform_indices = @transform_2, window_bounds = array<i64: 6, 512>}]} {
    %c0 = arith.constant 0 : index
    %c0_0 = arith.constant 0 : index
    %0 = vector.load %arg2[%c0, %c0_0] : memref<6x512xf32, #tpu.memory_space<vmem>>, vector<6x512xf32>
    %c0_1 = arith.constant 0 : index
    %c0_2 = arith.constant 0 : index
    %1 = vector.load %arg1[%c0_1, %c0_2] : memref<6x6xf32, #tpu.memory_space<vmem>>, vector<6x6xf32>
    %2 = vector.extract_strided_slice %1 {offsets = [0, 0], sizes = [6, 1], strides = [1, 1]} : vector<6x6xf32> to vector<6x1xf32>
    %3 = vector.extract_strided_slice %0 {offsets = [0, 0], sizes = [1, 512], strides = [1, 1]} : vector<6x512xf32> to vector<1x512xf32>
    %4 = vector.broadcast %2 : vector<6x1xf32> to vector<6x512xf32>
    %5 = vector.broadcast %3 : vector<1x512xf32> to vector<6x512xf32>
    %6 = arith.mulf %4, %5 : vector<6x512xf32>
    %7 = vector.extract_strided_slice %1 {offsets = [0, 1], sizes = [6, 1], strides = [1, 1]} : vector<6x6xf32> to vector<6x1xf32>
    %8 = vector.extract_strided_slice %0 {offsets = [1, 0], sizes = [1, 512], strides = [1, 1]} : vector<6x512xf32> to vector<1x512xf32>
    %9 = vector.broadcast %7 : vector<6x1xf32> to vector<6x512xf32>
    %10 = vector.broadcast %8 : vector<1x512xf32> to vector<6x512xf32>
    %11 = arith.mulf %9, %10 : vector<6x512xf32>
    %12 = arith.addf %6, %11 : vector<6x512xf32>
    %13 = vector.extract_strided_slice %1 {offsets = [0, 2], sizes = [6, 1], strides = [1, 1]} : vector<6x6xf32> to vector<6x1xf32>
    %14 = vector.extract_strided_slice %0 {offsets = [2, 0], sizes = [1, 512], strides = [1, 1]} : vector<6x512xf32> to vector<1x512xf32>
    %15 = vector.broadcast %13 : vector<6x1xf32> to vector<6x512xf32>
    %16 = vector.broadcast %14 : vector<1x512xf32> to vector<6x512xf32>
    %17 = arith.mulf %15, %16 : vector<6x512xf32>
    %18 = arith.addf %12, %17 : vector<6x512xf32>
    %19 = vector.extract_strided_slice %1 {offsets = [0, 3], sizes = [6, 1], strides = [1, 1]} : vector<6x6xf32> to vector<6x1xf32>
    %20 = vector.extract_strided_slice %0 {offsets = [3, 0], sizes = [1, 512], strides = [1, 1]} : vector<6x512xf32> to vector<1x512xf32>
    %21 = vector.broadcast %19 : vector<6x1xf32> to vector<6x512xf32>
    %22 = vector.broadcast %20 : vector<1x512xf32> to vector<6x512xf32>
    %23 = arith.mulf %21, %22 : vector<6x512xf32>
    %24 = arith.addf %18, %23 : vector<6x512xf32>
    %25 = vector.extract_strided_slice %1 {offsets = [0, 4], sizes = [6, 1], strides = [1, 1]} : vector<6x6xf32> to vector<6x1xf32>
    %26 = vector.extract_strided_slice %0 {offsets = [4, 0], sizes = [1, 512], strides = [1, 1]} : vector<6x512xf32> to vector<1x512xf32>
    %27 = vector.broadcast %25 : vector<6x1xf32> to vector<6x512xf32>
    %28 = vector.broadcast %26 : vector<1x512xf32> to vector<6x512xf32>
    %29 = arith.mulf %27, %28 : vector<6x512xf32>
    %30 = arith.addf %24, %29 : vector<6x512xf32>
    %31 = vector.extract_strided_slice %1 {offsets = [0, 5], sizes = [6, 1], strides = [1, 1]} : vector<6x6xf32> to vector<6x1xf32>
    %32 = vector.extract_strided_slice %0 {offsets = [5, 0], sizes = [1, 512], strides = [1, 1]} : vector<6x512xf32> to vector<1x512xf32>
    %33 = vector.broadcast %31 : vector<6x1xf32> to vector<6x512xf32>
    %34 = vector.broadcast %32 : vector<1x512xf32> to vector<6x512xf32>
    %35 = arith.mulf %33, %34 : vector<6x512xf32>
    %36 = arith.addf %30, %35 : vector<6x512xf32>
    %c0_3 = arith.constant 0 : index
    %c0_4 = arith.constant 0 : index
    %37 = vector.load %arg3[%c0_3, %c0_4] : memref<6x512xf32, #tpu.memory_space<vmem>>, vector<6x512xf32>
    tpu.vector_store %arg3[%c0_3, %c0_4], %36 {strides = array<i32>} : memref<6x512xf32, #tpu.memory_space<vmem>>, vector<6x512xf32>,
    return
  }
  func.func @transform_0(%arg0: i32) -> (i32, i32) {
    %c0_i32 = arith.constant 0 : i32
    %c0_i32_0 = arith.constant 0 : i32
    %c0_i32_1 = arith.constant 0 : i32
    return %c0_i32, %c0_i32_0 : i32, i32
  }
  func.func @transform_1(%arg0: i32) -> (i32, i32) {
    %c0_i32 = arith.constant 0 : i32
    %c0_i32_0 = arith.constant 0 : i32
    return %c0_i32, %arg0 : i32, i32
  }
  func.func @transform_2(%arg0: i32) -> (i32, i32) {
    %c0_i32 = arith.constant 0 : i32
    %c0_i32_0 = arith.constant 0 : i32
    return %c0_i32, %arg0 : i32, i32
  }
}

</mosaic_0001>

<bundles_post_ra>
// kernel: tpu_custom_call.1
= control target key start
LH: loop header
LB: loop body
LE: loop exit
PB: predicated region body
PF: predicated region fallthrough
CT: control target
= control target key end

     0   :  { %7 = vsyncpa [#allocation3], 0  ;;  %s924_s0 = inlined_call_operand.hbm [shape: f32[6,6], index: 0, kind: input, shape index: {}]   ;;  %s925_s1 = inlined_call_operand.hbm [shape: f32[6,1024], index: 1, kind: input, shape index: {}]   ;;  %s926_s2 = inlined_call_operand.hbm [shape: f32[6,1024], index: 2, kind: output, shape index: {}]  }
   0x1   :  { %8 = vsyncpa [#allocation6], 0 }
   0x2   :  { %10 = vsyncpa [#allocation6 + $0x1], 0 }
   0x3   :  { %11 = vsyncpa [#allocation4], 0 }
   0x4   :  { %13 = vsyncpa [#allocation4 + $0x1], 0  ;;  %s687_s9 = smov 0   ;;  %s689_s10 = smov 0  }
   0x5   :  { %s691_s11 = smov 0   ;;  %s693_s12 = smov 0  }
   0x6 LB: > { %s708_s13 = sadd.s32 4294967295, %s661_s12   ;;  %s446_s14 = sadd.s32 4294967294, %s661_s12   ;;  %s661_s12 = sphi %s693_s12, %s950_s12   ;;  %s657_s11 = sphi %s691_s11, %s949_s11   ;;  %s653_s10 = sphi %s689_s10, %s948_s10   ;;  %s649_s9 = sphi %s687_s9, %s947_s9  }
   0x7   : > { %p60_p0 = scmp.ne.s32.totalorder %s653_s10, %s649_s9  ;;  %p927_p1 = scmp.eq.s32.totalorder %s708_s13, 0 }
   0x8   : > { %p90_p3 = scmp.eq.s32.totalorder %s446_s14, 1  ;;  %p447_p5 = scmp.ge.s32.totalorder %s661_s12, 1 }
   0x9   : > { %p717_p4 = por %p927_p1, %p60_p0  ;;  %p97_p7 = scmp.lt.s32.totalorder %s661_s12, 3 }
   0xa   : > { %p722_p6 = por %p90_p3, %p60_p0  ;;  %s663_s18 = smov [#allocation2]  }
   0xb   : > { %s930_s15 = scalar_select %p717_p4, 1, 0 }
   0xc   : > { %s931_s16 = scalar_select %p722_p6, 1, 0 }
   0xd   : > { %p727_p8 = pnand %p447_p5, %p97_p7  ;;  %s110_s19 = sshll.u32 %s663_s18, 4  ;;  %s111_s19 = int_to_ptr.vmem [resolvable:$true] %s110_s19 }
   0xe   : > { %s735_s20 = sadd.s32 1, %s661_s12   ;;  %s47_s24 = sadd.s32 1, %s657_s11 }
   0xf   : > { %s932_s17 = scalar_select %p727_p8, 1, 0 }
  0x10   : > { %p472_p10 = pneg %p727_p8  ;;  %s44_s22 = ssub.s32 %s661_s12, %s735_s20 }
  0x11   : > { %p745_p12 = scmp.eq.s32.totalorder %s44_s22, 0  ;;  %s533_s27 = scalar_lea.hbm %s924_s0, 128 }
  0x12   : > { %p739_p11 = pnand %p472_p10, %p927_p1  ;;  %p534_p0 = scmp.ne.s32.totalorder %s924_s0, %s533_s27 }
  0x13   : > { %s934_s23 = scalar_select %p745_p12, 1, 0 }
  0x14   : > { %p535_p3 = pneg %p739_p11  ;;  %p540_p10 = scmp.lt.u32.totalorder %s533_s27, %s924_s0 }
  0x16   : > { %p536_p5 = pnand %p535_p3, %p534_p0 }
  0x18   : > { %p537_p7 = pneg %p536_p5 }
  0x1a   : > { %p542_p9 = pnand %p540_p10, %p537_p7 }
  0x1c   : > { %545 = shalt.err (!%p542_p9)
}
  0x1d   : > { %s546_s4 = scalar_lea.vmem %s111_s19, 128  ;;  %p554_p6 = scmp.lt.s32.totalorder %s111_s19, %s111_s19 }
  0x1e   : > { %p547_p1 = scmp.ne.s32.totalorder %s111_s19, %s546_s4  ;;  %p555_p4 = scmp.lt.s32.totalorder %s546_s4, %s546_s4 }
  0x20   : > { %p549_p2 = pnand %p547_p1, %p535_p3  ;;  %p556_p8 = por %p555_p4, %p554_p6 }
  0x22   : > { %p550_p13 = pneg %p549_p2 }
  0x24   : > { %p557_p12 = pnand %p556_p8, %p550_p13 }
  0x26   : > { %560 = shalt.err (!%p557_p12)
}
  0x27   : > { %475 = dma.hbm_to_vmem [thread:$0]  (!%p739_p11), %s924_s0, 128, %s111_s19, [#allocation3]  }
  0x28   : > { %p935_p1 = scmp.ne.s32.totalorder %s934_s23, 0  ;;  %p55_p2 = scmp.eq.s32.totalorder %s661_s12, 0 }
  0x29   : > { %p936_p4 = scmp.ne.s32.totalorder %s657_s11, %s653_s10  ;;  %p937_p6 = scmp.eq.s32.totalorder %s708_s13, 1 }
  0x2a   : > { %s771_s7 = scalar_select %p935_p1, %s657_s11, %s47_s24  }
  0x2b   : > { %p779_p8 = por %p937_p6, %p936_p4  ;;  %p485_p9 = scmp.lt.s32.totalorder %s661_s12, 2 }
  0x2c   : > { %s121_s14 = sand.u32 1, %s657_s11   ;;  %p939_p12 = pmov %p936_p4 }
  0x2d   : > { %s450_s18 = sshll.u32 %s121_s14, 5  ;;  %s462_s21 = sshll.u32 %s661_s12, 9 }
  0x2e   : > { %p56_p13 = por %p55_p2, %p939_p12  ;;  %s792_s19 = scalar_lea.hbm %s925_s1, %s462_s21 }
  0x2f   : > { %s125_s23 = scalar_lea.vmem [#allocation5], %s450_s18  ;;  %s122_s27 = scalar_lea.sflag [#allocation6], %s121_s14 }
  0x30   : > { %s133_s24 = sshll.u32 %s125_s23, 4  ;;  %p794_p11 = pnand %p485_p9, %p56_p13  ;;  %s798_s24 = int_to_ptr.vmem [resolvable:$true] %s133_s24 }
  0x31   : > { %s561_s28 = scalar_lea.hbm %s792_s19, 512  ;;  %s566_s3 = scalar_lea.hbm %s925_s1, 1024 }
  0x32   : > { %p562_p0 = scmp.ne.s32.totalorder %s792_s19, %s561_s28  ;;  %p563_p3 = pneg %p794_p11 }
  0x33   : > { %p567_p10 = scmp.lt.u32.totalorder %s792_s19, %s925_s1  ;;  %p568_p1 = scmp.lt.u32.totalorder %s566_s3, %s561_s28 }
  0x34   : > { %p564_p5 = pnand %p563_p3, %p562_p0  ;;  %p570_p4 = scmp.lt.u32.totalorder %s561_s28, %s792_s19 }
  0x35   : > { %p569_p2 = por %p568_p1, %p567_p10 }
  0x36   : > { %p565_p7 = pneg %p564_p5 }
  0x37   : > { %p571_p6 = por %p570_p4, %p569_p2 }
  0x39   : > { %p572_p9 = pnand %p571_p6, %p565_p7 }
  0x3b   : > { %575 = shalt.err (!%p572_p9)
}
  0x3c   : > { %s576_s6 = scalar_lea.vmem %s798_s24, 512  ;;  %s664_s14 = smov [#allocation5]  }
  0x3d   : > { %p577_p12 = scmp.ne.s32.totalorder %s798_s24, %s576_s6  ;;  %s581_s18 = sshll.u32 %s664_s14, 4  ;;  %s582_s18 = int_to_ptr.vmem [resolvable:$false] %s581_s18 }
  0x3e   : > { %s583_s21 = scalar_lea.vmem %s582_s18, 1024  ;;  %p584_p5 = scmp.lt.s32.totalorder %s798_s24, %s582_s18 }
  0x3f   : > { %p579_p13 = pnand %p577_p12, %p563_p3  ;;  %p585_p10 = scmp.lt.s32.totalorder %s583_s21, %s576_s6 }
  0x41   : > { %p580_p0 = pneg %p579_p13  ;;  %p586_p1 = por %p585_p10, %p584_p5 }
  0x43   : > { %p587_p2 = pnand %p586_p1, %p580_p0 }
  0x45   : > { %590 = shalt.err (!%p587_p2)
}
  0x46   : > { %479 = dma.hbm_to_vmem [thread:$0]  (!%p794_p11), %s792_s19, 512, %s798_s24, %s122_s27  }
  0x47   : > { %p941_p7 = scmp.ne.s32.totalorder %s932_s17, 0 }
  0x48   : > { %p942_p3 = scmp.eq.s32.totalorder (!%p941_p7), %s708_s13, 0 }
  0x49   : > { %142 = sbr.rel (%p941_p7) target bundleno = 247 (0xf7), region = 28 }
  0x50   : > { %636 = dma.done.wait (%p942_p3), [#allocation3], 128   ;;  %p943_p4 = pmov %p942_p3 }
  0x51   : > { %s832_s22 = sand.u32 1, %s653_s10   ;;  %p944_p11 = scmp.ne.s32.totalorder %s930_s15, 0 }
  0x52   : > { %638 = vsyncadd (%p943_p4), [#allocation3], 4294967168  ;;  %s455_s25 = sshll.u32 %s832_s22, 5  ;;  %s149_s23 = scalar_lea.sflag [#allocation6], %s832_s22 }
  0x53   : > { %s152_s19 = scalar_lea.vmem [#allocation5], %s455_s25 }
  0x54   : > { %640 = dma.done.wait (%p944_p11), %s149_s23, 512  }
  0x55   : > { %642 = vsyncadd (%p944_p11), %s149_s23, 4294966784  ;;  %v665_v0 = vmov 0   ;;  %v666_v1 = vmov 2   ;;  %v179_v2 = vld [vmem:[#allocation2] sm:$0x3f]  ;;  %v667_v3 = vmov 1   ;;  %v185_v7 = vlaneseq }
  0x56   : > { %527 = vset.pattern.permute.xlu0 %v665_v0  ;;  %529 = vset.pattern.permute.xlu1 %v666_v1  ;;  %v668_v4 = vmov 3   ;;  %v669_v5 = vmov 4   ;;  %v670_v6 = vmov 5   ;;  %v842_v10 = vld [vmem:[%s152_s19] sm:$0x3f]  ;;  %s463_s15 = sshll.u32 %s708_s13, 9 }
  0x57   : > { %182 = vperm.xlu0 %527, %v179_v2   ;;  %234 = vperm.xlu1 %529, %v179_v2   ;;  %v186_v8 = vshrl.u32 %v185_v7, 7  ;;  %v844_v11 = vld [vmem:[%s152_s19 + $0x8] sm:$0x3f]  ;;  %v846_v13 = vld [vmem:[%s152_s19 + $0x10] sm:$0x3f]  ;;  %s172_s17 = scalar_lea.vmem [#allocation7], %s455_s25  ;;  %s880_s28 = scalar_lea.hbm %s926_s2, %s463_s15 }
  0x58   : > { %v848_v14 = vld [vmem:[%s152_s19 + $0x18] sm:$0x3f]  ;;  %s364_s24 = sshll.u32 %s172_s17, 4  ;;  %s350_s13 = scalar_lea.sflag [#allocation4], %s832_s22  ;;  %s882_s24 = int_to_ptr.vmem [resolvable:$true] %s364_s24 }
  0x59   : > { %v187_v9 = vsub.s32 0, %v186_v8  ;;  %v239_v12 = vsub.s32 2, %v186_v8  ;;  %v211_v15 = vsub.s32 1, %v186_v8  ;;  %v267_v18 = vsub.s32 3, %v186_v8  ;;  %s591_s29 = scalar_lea.vmem %s882_s24, 512  ;;  %s671_s30 = smov [#allocation7]  }
  0x5a   : > { %v295_v22 = vsub.s32 4, %v186_v8  ;;  %v323_v28 = vsub.s32 5, %v186_v8  ;;  %p592_p6 = scmp.ne.s32.totalorder %s882_s24, %s591_s29  ;;  %s595_s3 = sshll.u32 %s671_s30, 4  ;;  %s596_s3 = int_to_ptr.vmem [resolvable:$false] %s595_s3 }
  0x5b   : > { %528 = vset.pattern.permute.xlu0 %v667_v3  ;;  %530 = vset.pattern.permute.xlu1 %v668_v4  ;;  %v188_v16 = vrot.slane %v842_v10, %v187_v9  ;;  %v192_v17 = vrot.slane %v844_v11, %v187_v9  ;;  %v196_v19 = vrot.slane %v846_v13, %v187_v9  ;;  %s597_s4 = scalar_lea.vmem %s596_s3, 1024  ;;  %p598_p13 = scmp.lt.s32.totalorder %s882_s24, %s596_s3 }
  0x5c   : > { %206 = vperm.xlu0 %528, %v179_v2   ;;  %262 = vperm.xlu1 %530, %v179_v2   ;;  %v200_v20 = vrot.slane %v848_v14, %v187_v9  ;;  %v240_v21 = vrot.slane %v842_v10, %v239_v12  ;;  %v244_v25 = vrot.slane %v844_v11, %v239_v12  ;;  %p593_p9 = pnand %p592_p6, %p779_p8  ;;  %p599_p0 = scmp.lt.s32.totalorder %s597_s4, %s591_s29 }
  0x5d   : > { %v248_v26 = vrot.slane %v846_v13, %v239_v12  ;;  %v252_v27 = vrot.slane %v848_v14, %v239_v12  ;;  %v212_v29 = vrot.slane %v842_v10, %v211_v15  ;;  %v216_v30 = vrot.slane %v844_v11, %v211_v15 }
  0x5e   : > { %v220_v31 = vrot.slane %v846_v13, %v211_v15  ;;  %v224_v32 = vrot.slane %v848_v14, %v211_v15  ;;  %v268_v33 = vrot.slane %v842_v10, %v267_v18  ;;  %v272_v34 = vrot.slane %v844_v11, %v267_v18  ;;  %p594_p12 = pneg %p593_p9  ;;  %p600_p5 = por %p599_p0, %p598_p13 }
  0x5f   : > { %v276_v35 = vrot.slane %v846_v13, %v267_v18  ;;  %v280_v36 = vrot.slane %v848_v14, %v267_v18  ;;  %v296_v37 = vrot.slane %v842_v10, %v295_v22  ;;  %v300_v38 = vrot.slane %v844_v11, %v295_v22 }
  0x60   : > { %531 = vset.pattern.permute.xlu1 %v669_v5  ;;  %532 = vset.pattern.permute.xlu0 %v670_v6  ;;  %v304_v39 = vrot.slane %v846_v13, %v295_v22  ;;  %v308_v40 = vrot.slane %v848_v14, %v295_v22  ;;  %v324_v41 = vrot.slane %v842_v10, %v323_v28  ;;  %p601_p10 = pnand %p600_p5, %p594_p12 }
  0x61   : > { %290 = vperm.xlu1 %531, %v179_v2   ;;  %318 = vperm.xlu0 %532, %v179_v2   ;;  %v328_v42 = vrot.slane %v844_v11, %v323_v28  ;;  %v332_v43 = vrot.slane %v846_v13, %v323_v28  ;;  %v336_v44 = vrot.slane %v848_v14, %v323_v28 }
  0xd6   : > { %v183_v23 = vpop.permute.xlu0 %182  ;;  %v235_v24 = vpop.permute.xlu1 %234 }
  0xd7   : > { %v201_v45 = vmul.f32 %v188_v16, %v183_v23  ;;  %v202_v46 = vmul.f32 %v192_v17, %v183_v23  ;;  %v203_v47 = vmul.f32 %v196_v19, %v183_v23  ;;  %v204_v48 = vmul.f32 %v200_v20, %v183_v23 }
  0xd8   : > { %v253_v55 = vmul.f32 %v240_v21, %v235_v24  ;;  %v254_v56 = vmul.f32 %v244_v25, %v235_v24  ;;  %v255_v57 = vmul.f32 %v248_v26, %v235_v24  ;;  %v256_v58 = vmul.f32 %v252_v27, %v235_v24 }
  0xdb   : > { %v207_v49 = vpop.permute.xlu0 %206  ;;  %v263_v50 = vpop.permute.xlu1 %262 }
  0xdc   : > { %v225_v51 = vmul.f32 %v212_v29, %v207_v49  ;;  %v226_v52 = vmul.f32 %v216_v30, %v207_v49  ;;  %v227_v53 = vmul.f32 %v220_v31, %v207_v49  ;;  %v228_v54 = vmul.f32 %v224_v32, %v207_v49 }
  0xdd   : > { %v281_v63 = vmul.f32 %v268_v33, %v263_v50  ;;  %v282_v0 = vmul.f32 %v272_v34, %v263_v50  ;;  %v283_v1 = vmul.f32 %v276_v35, %v263_v50  ;;  %v284_v2 = vmul.f32 %v280_v36, %v263_v50 }
  0xde   : > { %v229_v59 = vadd.f32 %v225_v51, %v201_v45  ;;  %v230_v60 = vadd.f32 %v226_v52, %v202_v46  ;;  %v231_v61 = vadd.f32 %v227_v53, %v203_v47  ;;  %v232_v62 = vadd.f32 %v228_v54, %v204_v48 }
  0xe0   : > { %v291_v3 = vpop.permute.xlu1 %290  ;;  %v257_v4 = vadd.f32 %v253_v55, %v229_v59  ;;  %v258_v5 = vadd.f32 %v254_v56, %v230_v60  ;;  %v259_v6 = vadd.f32 %v255_v57, %v231_v61  ;;  %v260_v7 = vadd.f32 %v256_v58, %v232_v62  ;;  %v319_v8 = vpop.permute.xlu0 %318 }
  0xe1   : > { %v309_v9 = vmul.f32 %v296_v37, %v291_v3  ;;  %v310_v10 = vmul.f32 %v300_v38, %v291_v3  ;;  %v311_v11 = vmul.f32 %v304_v39, %v291_v3  ;;  %v312_v12 = vmul.f32 %v308_v40, %v291_v3 }
  0xe2   : > { %v285_v13 = vadd.f32 %v281_v63, %v257_v4  ;;  %v286_v14 = vadd.f32 %v282_v0, %v258_v5  ;;  %v287_v15 = vadd.f32 %v283_v1, %v259_v6  ;;  %v288_v16 = vadd.f32 %v284_v2, %v260_v7 }
  0xe3   : > { %v337_v17 = vmul.f32 %v324_v41, %v319_v8  ;;  %v338_v18 = vmul.f32 %v328_v42, %v319_v8  ;;  %v339_v19 = vmul.f32 %v332_v43, %v319_v8  ;;  %v340_v20 = vmul.f32 %v336_v44, %v319_v8 }
  0xe4   : > { %v313_v21 = vadd.f32 %v309_v9, %v285_v13  ;;  %v314_v22 = vadd.f32 %v310_v10, %v286_v14  ;;  %v315_v23 = vadd.f32 %v311_v11, %v287_v15  ;;  %v316_v24 = vadd.f32 %v312_v12, %v288_v16 }
  0xe6   : > { %v341_v25 = vadd.f32 %v337_v17, %v313_v21  ;;  %v342_v26 = vadd.f32 %v338_v18, %v314_v22  ;;  %v343_v27 = vadd.f32 %v339_v19, %v315_v23  ;;  %v344_v28 = vadd.f32 %v340_v20, %v316_v24 }
  0xe8   : > { %345 = vst [vmem:[%s172_s17] sm:$0x3f] %v341_v25  ;;  %346 = vst [vmem:[%s172_s17 + $0x8] sm:$0x3f] %v342_v26 }
  0xe9   : > { %347 = vst [vmem:[%s172_s17 + $0x10] sm:$0x3f] %v343_v27  ;;  %348 = vst [vmem:[%s172_s17 + $0x18] sm:$0x3f] %v344_v28 }
  0xea   : > { %604 = shalt.err (!%p601_p10)
}
  0xeb   : > { %s605_s5 = scalar_lea.hbm %s880_s28, 512  ;;  %s609_s18 = scalar_lea.hbm %s926_s2, 1024 }
  0xec   : > { %p606_p1 = scmp.ne.s32.totalorder %s880_s28, %s605_s5  ;;  %p610_p3 = scmp.lt.u32.totalorder %s880_s28, %s926_s2 }
  0xed   : > { %p611_p4 = scmp.lt.u32.totalorder %s609_s18, %s605_s5  ;;  %p613_p6 = scmp.lt.u32.totalorder %s605_s5, %s880_s28 }
  0xee   : > { %p607_p2 = pnand %p606_p1, %p779_p8 }
  0xef   : > { %p612_p11 = por %p611_p4, %p610_p3 }
  0xf0   : > { %p608_p7 = pneg %p607_p2 }
  0xf1   : > { %p614_p9 = por %p613_p6, %p612_p11 }
  0xf3   : > { %p615_p12 = pnand %p614_p9, %p608_p7 }
  0xf5   : > { %618 = shalt.err (!%p615_p12)
}
  0xf6   : > { %470 = dma.vmem_to_hbm [thread:$0]  (%p779_p8), %s882_s24, 512, %s880_s28, %s350_s13  }
  0xf7 PF: > { %s376_s25 = sand.u32 1, %s649_s9   ;;  %p945_p13 = scmp.ne.s32.totalorder %s931_s16, 0 }
  0xf8   : > { %p946_p0 = scmp.ge.s32.totalorder %s661_s12, 2  ;;  %s377_s23 = scalar_lea.sflag [#allocation4], %s376_s25 }
  0xfa   : > { %p481_p5 = pnand %p946_p0, %p945_p13 }
  0xfc   : > { %644 = dma.done.wait (!%p481_p5), %s377_s23, 512  }
  0xfd   : > { %646 = vsyncadd (!%p481_p5), %s377_s23, 4294966784  ;;  %p16_p10 = scmp.ge.s32.totalorder %s735_s20, 4   ;;  %s947_s9 = smov %s653_s10 }
  0xfe   : > { %s948_s10 = smov %s657_s11  ;;  %s949_s11 = smov %s771_s7 }
  0xff   : > { %s950_s12 = smov %s735_s20  ;;  %18 = sbr.rel (!%p16_p10) target bundleno = 6 (0x6), region = 78 }
 0x106   :  { %382 = vsyncpa [#allocation3], 1 }
 0x107   :  { %384 = vsyncpa [#allocation3 + $0x1], 1 }
 0x108   :  { %385 = vsyncpa [#allocation6], 1 }
 0x109   :  { %387 = vsyncpa [#allocation6 + $0x1], 1 }
 0x10a   :  { %388 = vsyncpa [#allocation4], 1 }
 0x10b   :  { %390 = vsyncpa [#allocation4 + $0x1], 1 }

</bundles_post_ra>
